<compile_context>
chip_gen: v6e
topology: v6e:2x2x1
jax: 0.10.0
libtpu: 0.0.40
codegen_flags: <defaults>
</compile_context>

<pallas_src>
import functools
import math

import jax
import jax.numpy as jnp
from jax.experimental import pallas as pl
from jax.experimental.pallas import tpu as pltpu

_INV_SQRT2 = 1.0 / math.sqrt(2.0)
_SQRT_2_OVER_PI = math.sqrt(2.0 / math.pi)


def _gelu_exact(x):
    # nn.GELU() default is the exact (erf) variant; keep erf for parity.
    return 0.5 * x * (1.0 + jax.lax.erf(x * _INV_SQRT2))


def _gelu_tanh(x):
    # tanh approximation: transcendental lands on the EUP slot (free under MXU
    # work on v6e/v7x).  Enable via approx_gelu=True when ~1e-3 parity is OK.
    return 0.5 * x * (1.0 + jnp.tanh(_SQRT_2_OVER_PI * (x + 0.044715 * x * x * x)))


def _round_up(x, n):
    return ((x + n - 1) // n) * n


# --------------------------------------------------------------------------
# Kernels
# --------------------------------------------------------------------------
def _mlp_kernel_single(x_ref, w1_ref, b1_ref, w2_ref, b2_ref, o_ref, *, gelu):
    """Whole hidden dim resident: grid = (row_tiles,), no accumulator."""
    h = jnp.dot(x_ref[...], w1_ref[...], preferred_element_type=jnp.float32)
    h = gelu(h + b1_ref[...].astype(jnp.float32))
    # dropout(p=0.0) -> identity.
    out = jnp.dot(h.astype(x_ref.dtype), w2_ref[...],
                  preferred_element_type=jnp.float32)
    o_ref[...] = (out + b2_ref[...].astype(jnp.float32)).astype(o_ref.dtype)


def _mlp_kernel_acc(x_ref, w1_ref, b1_ref, w2_ref, b2_ref, o_ref, acc_ref, *,
                    gelu):
    """Hidden dim chunked: grid = (row_tiles, k_tiles), f32 VMEM accumulator."""
    k = pl.program_id(1)

    h = jnp.dot(x_ref[...], w1_ref[...], preferred_element_type=jnp.float32)
    h = gelu(h + b1_ref[...].astype(jnp.float32))
    upd = jnp.dot(h.astype(x_ref.dtype), w2_ref[...],
                  preferred_element_type=jnp.float32)

    @pl.when(k == 0)
    def _():
        acc_ref[...] = upd          # write directly: no zero-init pass

    @pl.when(k != 0)
    def _():
        acc_ref[...] += upd

    @pl.when(k == pl.num_programs(1) - 1)
    def _():
        o_ref[...] = (acc_ref[...]
                      + b2_ref[...].astype(jnp.float32)).astype(o_ref.dtype)


# --------------------------------------------------------------------------
# Tile selection / VMEM budgeting
# --------------------------------------------------------------------------
def _vmem_capacity_bytes():
    try:
        info = pltpu.get_tpu_info()
        for attr in ("vmem_capacity_bytes", "vmem_size_bytes", "vmem_bytes"):
            v = getattr(info, attr, None)
            if v:
                return int(v)
    except Exception:
        pass
    return 64 * 1024 * 1024  # conservative default (v7x per-TC)


def _vmem_budget_bytes():
    cap = _vmem_capacity_bytes()
    # ~48 MiB on a 64 MiB chip (v7x), ~104 MiB on a 128 MiB chip (v5e/v6e);
    # leave headroom for compiler-internal scratch.
    return int(max(cap - 24 * 1024 * 1024, cap * 3 // 4))


def _vmem_tile_bytes(tm, tk, nk, d_in, d_out, itemsize):
    """Conservative working-set estimate (2-deep pipelining on every spec)."""
    w = 2 * (d_in * tk + tk * d_out) * itemsize            # w1 + w2 chunks
    x = 2 * tm * d_in * itemsize
    o = 2 * tm * d_out * itemsize
    h = tm * tk * 4 + tm * tk * itemsize                    # f32 h + cast copy
    acc = tm * d_out * 4 if nk > 1 else 0
    bias = 2 * (tk + d_out) * itemsize
    return w + x + o + h + acc + bias


def _select_tiles(m, d_in, d_h, d_out, itemsize, budget, tm_req, tk_cap):
    """Return (tm_eff, tk_eff, d_h_pad, nk)."""
    tm_eff = min(tm_req, _round_up(m, 8))
    while True:
        # Option A: whole hidden dim resident, no padding of D_h (block equals
        # the full array dim so the (8,128) constraint does not apply).
        if (tk_cap is None or tk_cap >= d_h) and \
                _vmem_tile_bytes(tm_eff, d_h, 1, d_in, d_out, itemsize) <= budget:
            return tm_eff, d_h, d_h, 1

        # Option B: pad D_h only to a multiple of 128 and pick the largest
        # 128-multiple chunk that divides it and fits the budget.
        d_h_pad = _round_up(d_h, 128)
        units = d_h_pad // 128
        for u in range(units, 0, -1):
            if units % u:
                continue
            tk_eff = u * 128
            if tk_cap is not None and tk_eff > max(tk_cap, 128):
                continue
            nk = units // u
            if _vmem_tile_bytes(tm_eff, tk_eff, nk, d_in, d_out,
                                itemsize) <= budget:
                return tm_eff, tk_eff, d_h_pad, nk

        if tm_eff <= 8:
            # Last resort: smallest tiles regardless of the estimate.
            return 8, 128, _round_up(d_h, 128), _round_up(d_h, 128) // 128
        tm_eff = max(8, _round_up(tm_eff // 2, 8))


# --------------------------------------------------------------------------
# Parameter prep (one-time; hoists per-call weight padding out of the forward)
# --------------------------------------------------------------------------
def prepare_mlp_params(w1, b1, w2, b2):
    """Pad the hidden dim of (w1, b1, w2) to a multiple of 128 once.

    GELU(0) = 0 and the padded rows of w2 are zero, so padded hidden columns
    contribute nothing.  Call this once at init so mlp_forward never pads
    weights per step.
    """
    d_h = w1.shape[1]
    d_h_pad = _round_up(d_h, 128)
    if d_h_pad != d_h:
        w1 = jnp.pad(w1, ((0, 0), (0, d_h_pad - d_h)))
        b1 = jnp.pad(b1, (0, d_h_pad - d_h))
        w2 = jnp.pad(w2, ((0, d_h_pad - d_h), (0, 0)))
    return w1, b1, w2, b2


# --------------------------------------------------------------------------
# Forward
# --------------------------------------------------------------------------
def mlp_forward(x, w1, b1, w2, b2, *, tm=512, tk=None, approx_gelu=False):
    """x: (..., D_in) -> (..., D_out).  w1: (D_in, D_h), w2: (D_h, D_out).

    tk=None lets the VMEM budget pick the hidden chunk (preferring tk = D_h,
    i.e. full weight residency).  bf16 x/w is the fast MXU path.
    """
    d_in, d_h = w1.shape
    d_out = w2.shape[1]
    assert x.shape[-1] == d_in
    lead = x.shape[:-1]
    m = math.prod(lead) if lead else 1
    x2 = x.reshape(m, d_in)
    itemsize = x2.dtype.itemsize

    budget = _vmem_budget_bytes()
    tm_eff, tk_eff, d_h_pad, nk = _select_tiles(
        m, d_in, d_h, d_out, itemsize, budget, tm, tk)

    m_pad = _round_up(m, tm_eff)
    if m_pad != m:
        x2 = jnp.pad(x2, ((0, m_pad - m), (0, 0)))

    # Per-call fallback only; use prepare_mlp_params() once at init instead.
    if d_h_pad != d_h:
        w1 = jnp.pad(w1, ((0, 0), (0, d_h_pad - d_h)))
        b1 = jnp.pad(b1, (0, d_h_pad - d_h))
        w2 = jnp.pad(w2, ((0, d_h_pad - d_h), (0, 0)))

    b1_2d = b1.reshape(1, d_h_pad)
    b2_2d = b2.reshape(1, d_out)

    gelu = _gelu_tanh if approx_gelu else _gelu_exact
    n_row_tiles = m_pad // tm_eff
    weight_passes = n_row_tiles if nk > 1 else 1
    wbytes = (w1.size * w1.dtype.itemsize + w2.size * w2.dtype.itemsize
              + b1_2d.size * b1_2d.dtype.itemsize)
    cost = pl.CostEstimate(
        flops=2 * m_pad * (d_in * d_h_pad + d_h_pad * d_out),
        transcendentals=m_pad * d_h_pad,
        bytes_accessed=int(x2.size * itemsize
                           + weight_passes * wbytes
                           + b2_2d.size * b2_2d.dtype.itemsize
                           + m_pad * d_out * x.dtype.itemsize),
    )
    cparams = pltpu.CompilerParams(
        dimension_semantics=("parallel",) if nk == 1 else ("parallel", "arbitrary"),
        vmem_limit_bytes=int(budget),
    )

    if nk == 1:
        # Weights stay resident across all row tiles (constant index maps).
        out = pl.pallas_call(
            functools.partial(_mlp_kernel_single, gelu=gelu),
            out_shape=jax.ShapeDtypeStruct((m_pad, d_out), x.dtype),
            grid_spec=pltpu.PrefetchScalarGridSpec(
                num_scalar_prefetch=0,
                grid=(n_row_tiles,),
                in_specs=[
                    pl.BlockSpec((tm_eff, d_in), lambda i: (i, 0)),
                    pl.BlockSpec((d_in, d_h_pad), lambda i: (0, 0)),
                    pl.BlockSpec((1, d_h_pad), lambda i: (0, 0)),
                    pl.BlockSpec((d_h_pad, d_out), lambda i: (0, 0)),
                    pl.BlockSpec((1, d_out), lambda i: (0, 0)),
                ],
                out_specs=pl.BlockSpec((tm_eff, d_out), lambda i: (i, 0)),
            ),
            compiler_params=cparams,
            cost_estimate=cost,
        )(x2, w1, b1_2d, w2, b2_2d)
    else:
        out = pl.pallas_call(
            functools.partial(_mlp_kernel_acc, gelu=gelu),
            out_shape=jax.ShapeDtypeStruct((m_pad, d_out), x.dtype),
            grid_spec=pltpu.PrefetchScalarGridSpec(
                num_scalar_prefetch=0,
                grid=(n_row_tiles, nk),
                in_specs=[
                    pl.BlockSpec((tm_eff, d_in), lambda i, k: (i, 0)),
                    pl.BlockSpec((d_in, tk_eff), lambda i, k: (0, k)),
                    pl.BlockSpec((1, tk_eff), lambda i, k: (0, k)),
                    pl.BlockSpec((tk_eff, d_out), lambda i, k: (k, 0)),
                    pl.BlockSpec((1, d_out), lambda i, k: (0, 0)),
                ],
                out_specs=pl.BlockSpec((tm_eff, d_out), lambda i, k: (i, 0)),
                scratch_shapes=[pltpu.VMEM((tm_eff, d_out), jnp.float32)],
            ),
            compiler_params=cparams,
            cost_estimate=cost,
        )(x2, w1, b1_2d, w2, b2_2d)

    if m_pad != m:
        out = out[:m]
    return out.reshape(*lead, d_out)


# --------------------------------------------------------------------------
# Reference / init
# --------------------------------------------------------------------------
def init_mlp_params(key, in_features, hidden_features=None, out_features=None,
                    dtype=jnp.float32):
    """Init matching nn.Linear's U(-1/sqrt(fan_in), 1/sqrt(fan_in))."""
    hidden_features = hidden_features or in_features
    out_features = out_features or in_features
    k1, k2, k3, k4 = jax.random.split(key, 4)

    bound1 = 1.0 / math.sqrt(in_features)
    w1 = jax.random.uniform(k1, (in_features, hidden_features), dtype,
                            minval=-bound1, maxval=bound1)
    b1 = jax.random.uniform(k2, (hidden_features,), dtype,
                            minval=-bound1, maxval=bound1)

    bound2 = 1.0 / math.sqrt(hidden_features)
    w2 = jax.random.uniform(k3, (hidden_features, out_features), dtype,
                            minval=-bound2, maxval=bound2)
    b2 = jax.random.uniform(k4, (out_features,), dtype,
                            minval=-bound2, maxval=bound2)
    return w1, b1, w2, b2


def mlp_reference(x, w1, b1, w2, b2):
    h = x @ w1 + b1
    h = 0.5 * h * (1.0 + jax.lax.erf(h / math.sqrt(2.0)))
    return h @ w2 + b2


if __name__ == "__main__":
    key = jax.random.PRNGKey(0)

    # --- Test 1: small shape (single row tile, full-residency fast path). ---
    batch, seq, in_features, hidden_features = 2, 8, 32, 64
    out_features = in_features
    kx, kp, kb = jax.random.split(key, 3)
    x = jax.random.normal(kx, (batch, seq, in_features), jnp.float32)
    w1, b1, w2, b2 = init_mlp_params(kp, in_features, hidden_features, out_features)

    y = jax.block_until_ready(mlp_forward(x, w1, b1, w2, b2))
    y_ref = mlp_reference(x, w1, b1, w2, b2)
    assert y.shape == (batch, seq, out_features)
    assert jnp.allclose(y, y_ref, atol=1e-5, rtol=1e-5), "test1 mismatch"

    # --- Test 2: ragged M + forced hidden chunking (exercises row padding,
    #     multi-step grid, f32 accumulator with write-on-first-step). Weights
    #     are pre-padded once via prepare_mlp_params (hoisted out of forward).
    b2_, s2_, din2, dh2, dout2 = 2, 100, 64, 192, 64
    kx2, kp2 = jax.random.split(kb)
    x2 = jax.random.normal(kx2, (b2_, s2_, din2), jnp.float32)
    w1b, b1b, w2b, b2b = init_mlp_params(kp2, din2, dh2, dout2)
    w1p, b1p, w2p, b2p = prepare_mlp_params(w1b, b1b, w2b, b2b)
    y2 = jax.block_until_ready(
        mlp_forward(x2, w1p, b1p, w2p, b2p, tm=64, tk=128))
    y2_ref = mlp_reference(x2, w1b, b1b, w2b, b2b)
    assert y2.shape == (b2_, s2_, dout2)
    assert jnp.allclose(y2, y2_ref, atol=1e-4, rtol=1e-4), "test2 mismatch"

    # --- Test 3: native bf16 perf path (bf16 x bf16 -> f32 MXU, f32 epilogue).
    xb = x.astype(jnp.bfloat16)
    yb = jax.block_until_ready(
        mlp_forward(xb, w1.astype(jnp.bfloat16), b1.astype(jnp.bfloat16),
                    w2.astype(jnp.bfloat16), b2.astype(jnp.bfloat16)))
    assert yb.dtype == jnp.bfloat16
    assert bool(jnp.all(jnp.isfinite(yb.astype(jnp.float32))))
    # Loose tolerance vs f32 reference: expected bf16 MXU rounding, not a bug.
    assert jnp.allclose(yb.astype(jnp.float32), y_ref, atol=5e-2, rtol=5e-2)

    print("KERNEL_OK")
</pallas_src>

<mosaic_0001>
module attributes {stable_mosaic.version = 11 : i64} {
  func.func @_mlp_kernel_single(%arg0: i32, %arg1: memref<16x32xf32, #tpu.memory_space<vmem>>, %arg2: memref<32x64xf32, #tpu.memory_space<vmem>>, %arg3: memref<1x64xf32, #tpu.memory_space<vmem>>, %arg4: memref<64x32xf32, #tpu.memory_space<vmem>>, %arg5: memref<1x32xf32, #tpu.memory_space<vmem>>, %arg6: memref<16x32xf32, #tpu.memory_space<vmem>>) attributes {dimension_semantics = [#tpu.dimension_semantics<parallel>], iteration_bounds = array<i64: 1>, scalar_prefetch = 0 : i64, scratch_operands = 0 : i64, tpu.core_type = #tpu.core_type<tc>, window_params = [{transform_indices = @transform_0, window_bounds = array<i64: 16, 32>}, {pipeline_mode = #tpu.pipeline_mode<synchronous>, transform_indices = @transform_1, window_bounds = array<i64: 32, 64>}, {pipeline_mode = #tpu.pipeline_mode<synchronous>, transform_indices = @transform_2, window_bounds = array<i64: 1, 64>}, {pipeline_mode = #tpu.pipeline_mode<synchronous>, transform_indices = @transform_3, window_bounds = array<i64: 64, 32>}, {pipeline_mode = #tpu.pipeline_mode<synchronous>, transform_indices = @transform_4, window_bounds = array<i64: 1, 32>}, {transform_indices = @transform_5, window_bounds = array<i64: 16, 32>}]} {
    %c0 = arith.constant 0 : index
    %c0_0 = arith.constant 0 : index
    %0 = vector.load %arg1[%c0, %c0_0] : memref<16x32xf32, #tpu.memory_space<vmem>>, vector<16x32xf32>
    %c0_1 = arith.constant 0 : index
    %c0_2 = arith.constant 0 : index
    %1 = vector.load %arg2[%c0_1, %c0_2] : memref<32x64xf32, #tpu.memory_space<vmem>>, vector<32x64xf32>
    %cst = arith.constant dense<0.000000e+00> : vector<16x64xf32>
    %2 = tpu.matmul %0, %1, %cst {dimension_numbers = #tpu.dot_dimension_numbers<[1], [0], [0], [1], [0, 0, 1, 1], [], []>} : vector<16x32xf32>, vector<32x64xf32>, vector<16x64xf32> -> vector<16x64xf32>
    %c0_3 = arith.constant 0 : index
    %c0_4 = arith.constant 0 : index
    %3 = vector.load %arg3[%c0_3, %c0_4] : memref<1x64xf32, #tpu.memory_space<vmem>>, vector<1x64xf32>
    %4 = vector.broadcast %3 : vector<1x64xf32> to vector<16x64xf32>
    %5 = arith.addf %2, %4 : vector<16x64xf32>
    %cst_5 = arith.constant 5.000000e-01 : f32
    %6 = vector.broadcast %cst_5 : f32 to vector<16x64xf32>
    %7 = arith.mulf %6, %5 : vector<16x64xf32>
    %cst_6 = arith.constant 0.707106769 : f32
    %8 = vector.broadcast %cst_6 : f32 to vector<16x64xf32>
    %9 = arith.mulf %5, %8 : vector<16x64xf32>
    %10 = math.erf %9 : vector<16x64xf32>
    %cst_7 = arith.constant 1.000000e+00 : f32
    %11 = vector.broadcast %cst_7 : f32 to vector<16x64xf32>
    %12 = arith.addf %11, %10 : vector<16x64xf32>
    %13 = arith.mulf %7, %12 : vector<16x64xf32>
    %c0_8 = arith.constant 0 : index
    %c0_9 = arith.constant 0 : index
    %14 = vector.load %arg4[%c0_8, %c0_9] : memref<64x32xf32, #tpu.memory_space<vmem>>, vector<64x32xf32>
    %cst_10 = arith.constant dense<0.000000e+00> : vector<16x32xf32>
    %15 = tpu.matmul %13, %14, %cst_10 {dimension_numbers = #tpu.dot_dimension_numbers<[1], [0], [0], [1], [0, 0, 1, 1], [], []>} : vector<16x64xf32>, vector<64x32xf32>, vector<16x32xf32> -> vector<16x32xf32>
    %c0_11 = arith.constant 0 : index
    %c0_12 = arith.constant 0 : index
    %16 = vector.load %arg5[%c0_11, %c0_12] : memref<1x32xf32, #tpu.memory_space<vmem>>, vector<1x32xf32>
    %17 = vector.broadcast %16 : vector<1x32xf32> to vector<16x32xf32>
    %18 = arith.addf %15, %17 : vector<16x32xf32>
    %c0_13 = arith.constant 0 : index
    %c0_14 = arith.constant 0 : index
    %19 = vector.load %arg6[%c0_13, %c0_14] : memref<16x32xf32, #tpu.memory_space<vmem>>, vector<16x32xf32>
    tpu.vector_store %arg6[%c0_13, %c0_14], %18 {strides = array<i32>} : memref<16x32xf32, #tpu.memory_space<vmem>>, vector<16x32xf32>,
    return
  }
  func.func @transform_0(%arg0: i32) -> (i32, i32) {
    %c0_i32 = arith.constant 0 : i32
    %c0_i32_0 = arith.constant 0 : i32
    return %arg0, %c0_i32 : i32, i32
  }
  func.func @transform_1(%arg0: i32) -> (i32, i32) {
    %c0_i32 = arith.constant 0 : i32
    %c0_i32_0 = arith.constant 0 : i32
    %c0_i32_1 = arith.constant 0 : i32
    return %c0_i32, %c0_i32_0 : i32, i32
  }
  func.func @transform_2(%arg0: i32) -> (i32, i32) {
    %c0_i32 = arith.constant 0 : i32
    %c0_i32_0 = arith.constant 0 : i32
    %c0_i32_1 = arith.constant 0 : i32
    return %c0_i32, %c0_i32_0 : i32, i32
  }
  func.func @transform_3(%arg0: i32) -> (i32, i32) {
    %c0_i32 = arith.constant 0 : i32
    %c0_i32_0 = arith.constant 0 : i32
    %c0_i32_1 = arith.constant 0 : i32
    return %c0_i32, %c0_i32_0 : i32, i32
  }
  func.func @transform_4(%arg0: i32) -> (i32, i32) {
    %c0_i32 = arith.constant 0 : i32
    %c0_i32_0 = arith.constant 0 : i32
    %c0_i32_1 = arith.constant 0 : i32
    return %c0_i32, %c0_i32_0 : i32, i32
  }
  func.func @transform_5(%arg0: i32) -> (i32, i32) {
    %c0_i32 = arith.constant 0 : i32
    %c0_i32_0 = arith.constant 0 : i32
    return %arg0, %c0_i32 : i32, i32
  }
}

</mosaic_0001>

<bundles_post_ra>
// kernel: tpu_custom_call.1
= control target key start
LH: loop header
LB: loop body
LE: loop exit
PB: predicated region body
PF: predicated region fallthrough
CT: control target
= control target key end

     0   :  { %vm34_vm0 = vcmask 261120   ;;  %s410_s0 = inlined_call_operand.vmem [shape: f32[16,32], index: 0, kind: input, shape index: {}]   ;;  %s411_s1 = inlined_call_operand.vmem [shape: f32[32,64], index: 1, kind: input, shape index: {}]   ;;  %s412_s2 = inlined_call_operand.vmem [shape: f32[1,64], index: 2, kind: input, shape index: {}]   ;;  %s413_s3 = inlined_call_operand.vmem [shape: f32[64,32], index: 3, kind: input, shape index: {}]   ;;  %s414_s4 = inlined_call_operand.vmem [shape: f32[1,32], index: 4, kind: input, shape index: {}]   ;;  %s415_s5 = inlined_call_operand.hbm [shape: f32[16,32], index: 5, kind: output, shape index: {}]  }
   0x1   :  { %v26_v0 = vld [vmem:[%s411_s1 + $0x18] sm:$0xff]  ;;  %v25_v1 = vld [vmem:[%s411_s1 + $0x10] sm:$0xff]  ;;  %v21_v2 = vld [vmem:[%s410_s0] sm:$0xff] }
   0x2   :  { %263 = vmatprep.subr.mxu0 %v26_v0  ;;  %v24_v3 = vld [vmem:[%s411_s1 + $0x8] sm:$0xff]  ;;  %271 = vmatprep.mubr.msk.f32.mxu0 %vm34_vm0, %v21_v2 }
   0x3   :  { %264 = vmatpush3.msra.mxu0 %v26_v0 }
   0x4   :  { %10 = vsyncpa [#allocation3], 0  ;;  %265 = vmatprep.subr.mxu0 %v25_v1  ;;  %v23_v4 = vld [vmem:[%s411_s1] sm:$0xff]  ;;  %v22_v5 = vld [vmem:[%s410_s0 + $0x8] sm:$0xff]  ;;  %vm141_vm1 = vcmask 523264   ;;  %s322_s21 = smov [#allocation2]  }
   0x5   :  { %266 = vmatpush3.msra.mxu0 %v25_v1  ;;  %v133_v6 = vld [vmem:[%s413_s3 + $0x38] sm:$0xff]  ;;  %v132_v7 = vld [vmem:[%s413_s3 + $0x30] sm:$0xff]  ;;  %v131_v8 = vld [vmem:[%s413_s3 + $0x28] sm:$0xff]  ;;  %s230_s22 = sshll.u32 %s322_s21, 4  ;;  %s231_s22 = int_to_ptr.vmem [resolvable:$true] %s230_s22 }
   0x6   :  { %267 = vmatprep.subr.mxu0 %v24_v3  ;;  %274 = vmatprep.subr.mxu1 %v133_v6  ;;  %v130_v9 = vld [vmem:[%s413_s3 + $0x20] sm:$0xff]  ;;  %v129_v10 = vld [vmem:[%s413_s3 + $0x18] sm:$0xff]  ;;  %v128_v11 = vld [vmem:[%s413_s3 + $0x10] sm:$0xff]  ;;  %s300_s23 = scalar_lea.vmem %s231_s22, 256  ;;  %p305_p1 = scmp.lt.s32.totalorder %s231_s22, %s231_s22 }
   0x7   :  { %268 = vmatpush3.msra.mxu0 %v24_v3  ;;  %275 = vmatpush3.msra.mxu1 %v133_v6  ;;  %v127_v12 = vld [vmem:[%s413_s3 + $0x8] sm:$0xff]  ;;  %v126_v13 = vld [vmem:[%s413_s3] sm:$0xff]  ;;  %p301_p0 = scmp.ne.s32.totalorder %s231_s22, %s300_s23  ;;  %p306_p2 = scmp.lt.s32.totalorder %s300_s23, %s300_s23 }
   0x8   :  { %269 = vmatprep.subr.mxu0 %v23_v4  ;;  %276 = vmatprep.subr.mxu1 %v132_v7  ;;  %v241_v14 = vld [vmem:[%s412_s2] ss:$0 sm:$0xff] }
   0x9   :  { %270 = vmatpush3.msra.mxu0 %v23_v4  ;;  %277 = vmatpush3.msra.mxu1 %v132_v7  ;;  %v244_v29 = vld [vmem:[%s414_s4] ss:$0 sm:$0xff]  ;;  %p307_p3 = por %p306_p2, %p305_p1 }
   0xa   :  { %272 = vmatmul.mubr.msk.f32.vlgmr.msra.gmra.mxu0 %vm34_vm0, %v22_v5  ;;  %278 = vmatprep.subr.mxu1 %v131_v8 }
   0xb   :  { %279 = vmatpush3.msra.mxu1 %v131_v8  ;;  %p308_p4 = pnand %p307_p3, %p301_p0 }
   0xc   :  { %280 = vmatprep.subr.mxu1 %v130_v9 }
   0xd   :  { %281 = vmatpush3.msra.mxu1 %v130_v9 }
   0xe   :  { %282 = vmatprep.subr.mxu1 %v129_v10 }
   0xf   :  { %283 = vmatpush3.msra.mxu1 %v129_v10 }
  0x10   :  { %284 = vmatprep.subr.mxu1 %v128_v11 }
  0x11   :  { %285 = vmatpush3.msra.mxu1 %v128_v11 }
  0x12   :  { %286 = vmatprep.subr.mxu1 %v127_v12 }
  0x13   :  { %287 = vmatpush3.msra.mxu1 %v127_v12 }
  0x14   :  { %288 = vmatprep.subr.mxu1 %v126_v13 }
  0x15   :  { %289 = vmatpush3.msra.mxu1 %v126_v13 }
  0xca   :  { %v273_v15 = vpop.f32.mrf.mxu0 }
  0xcb   :  { %v113_v16 = vadd.f32 %v273_v15, %v241_v14 }
  0xcc   :  { %v107_v17 = vpop.f32.mrf.mxu0 }
  0xcd   :  { %v119_v18 = vmul.f32 0.70710677, %v113_v16  ;;  %v108_v19 = vadd.f32 %v241_v14, %v107_v17  ;;  %v117_v26 = vmul.f32 0.5, %v113_v16 }
  0xcf   :  { %296 = verf.f32 %v119_v18  ;;  %v118_v20 = vmul.f32 0.70710677, %v108_v19  ;;  %v116_v24 = vmul.f32 0.5, %v108_v19 }
  0xd1   :  { %298 = verf.f32 %v118_v20 }
  0xdc   :  { %v297_v21 = vpop.eup %296 }
  0xdd   :  { %v123_v23 = vadd.f32 1.0, %v297_v21 }
  0xde   :  { %v299_v22 = vpop.eup %298 }
  0xdf   :  { %v122_v25 = vadd.f32 1.0, %v299_v22  ;;  %v125_v28 = vmul.f32 %v123_v23, %v117_v26 }
  0xe1   :  { %v124_v27 = vmul.f32 %v122_v25, %v116_v24 }
  0xe3   :  { %290 = vmatprep.mubr.msk.f32.mxu1 %vm141_vm1, %v124_v27 }
  0xe4   :  { %291 = vmatmul.mubr.msk.f32.vlgmr.msra.gmra.mxu1 %vm141_vm1, %v125_v28 }
 0x1a4   :  { %v292_v30 = vpop.f32.mrf.mxu1 }
 0x1a5   :  { %v220_v31 = vadd.f32 %v292_v30, %v244_v29 }
 0x1a6   :  { %v214_v32 = vpop.f32.mrf.mxu1 }
 0x1a7   :  { %224 = vst.msk [vmem:[#allocation2 + $0x8] sm:$0xff] %vm34_vm0, %v220_v31  ;;  %v215_v33 = vadd.f32 %v244_v29, %v214_v32 }
 0x1a9   :  { %223 = vst.msk [vmem:[#allocation2] sm:$0xff] %vm34_vm0, %v215_v33 }
 0x1aa   :  { %311 = shalt.err (!%p308_p4)
}
 0x1ab   :  { %s323_s24 = smov 128   ;;  %s324_s4 = smov 8  }
 0x1ac   :  { %236 = dma.vmem_to_hbm [thread:$0]  %s231_s22, 256, %s415_s5, [#allocation3], %s323_s24, %s323_s24, %s324_s4  }
 0x1ad   :  { %320 = dma.done.wait [#allocation3], 256  }
 0x1ae   :  { %321 = vsyncadd [#allocation3], 4294967040 }
 0x1af   :  { %240 = vsyncpa [#allocation3], 1 }

</bundles_post_ra>
